<compile_context>
chip_gen: v7x
topology: tpu7x:2x2x1
jax: 0.10.0
libtpu: 0.0.40
codegen_flags: <defaults>
</compile_context>

<pallas_src>
import functools

import jax
import jax.numpy as jnp
from jax import lax
from jax.experimental import pallas as pl
from jax.experimental.pallas import tpu as pltpu

NUM_GROUPS = 32
EPS = 1e-6


# ----------------------------------------------------------------------------
# helpers
# ----------------------------------------------------------------------------
def _vmem_cap_bytes():
    """Physical VMEM of the local chip (fallback: 128 MiB)."""
    try:
        return int(pltpu.get_tpu_info().vmem_capacity_bytes)
    except Exception:
        return 128 << 20


def _pick_tile(n, cap):
    """Largest power-of-two-ish tile <= cap that evenly divides n (fallback: n)."""
    if n <= cap:
        return n
    t = cap
    while t >= 128:
        if n % t == 0:
            return t
        t //= 2
    return n


def _vmem_limit(vmem_cap, est_bytes):
    """Explicit scoped-VMEM budget: tile estimate + headroom, capped below physical."""
    return int(min(max(est_bytes + (16 << 20), 32 << 20), int(0.85 * vmem_cap)))


# ----------------------------------------------------------------------------
# kernel 1: GroupNorm statistics (sum / sum-of-squares per (batch, channel))
# ----------------------------------------------------------------------------
def gn_stats_kernel(x_ref, s1_ref, s2_ref):
    @pl.when(pl.program_id(1) == 0)
    def _():
        s1_ref[...] = jnp.zeros_like(s1_ref)
        s2_ref[...] = jnp.zeros_like(s2_ref)

    x = x_ref[0]                                              # (TS, C) f32
    s1_ref[0] = s1_ref[0] + jnp.sum(x, axis=0, keepdims=True)       # sublane reduce
    s2_ref[0] = s2_ref[0] + jnp.sum(x * x, axis=0, keepdims=True)


# ----------------------------------------------------------------------------
# kernel 2: GroupNorm normalize + affine, then q / k / v 1x1 convs (bf16 MXU)
# ----------------------------------------------------------------------------
def norm_qkv_kernel(x_ref, s1_ref, s2_ref, mcg_ref, mgc_ref, gamma_ref, beta_ref,
                    wq_ref, bq_ref, wk_ref, bk_ref, wv_ref, bv_ref,
                    q_ref, kt_ref, v_ref, *, n_per_group):
    x = x_ref[0]                                              # (TS, C) f32

    # per-(sample, group) stats from the precomputed channel sums (tiny matmuls)
    gsum = jnp.dot(s1_ref[0], mcg_ref[...], preferred_element_type=jnp.float32)   # (1, G)
    gsum2 = jnp.dot(s2_ref[0], mcg_ref[...], preferred_element_type=jnp.float32)  # (1, G)
    mean_g = gsum / n_per_group
    # guard E[x^2]-E[x]^2 against cancellation going slightly negative
    var_g = jnp.maximum(gsum2 / n_per_group - mean_g * mean_g, 0.0)
    inv_g = lax.rsqrt(var_g + EPS)
    mean_c = jnp.dot(mean_g, mgc_ref[...], preferred_element_type=jnp.float32)    # (1, C)
    inv_c = jnp.dot(inv_g, mgc_ref[...], preferred_element_type=jnp.float32)      # (1, C)

    # normalize + affine in f32 on the VPU, downcast once for the MXU
    h = ((x - mean_c) * inv_c) * gamma_ref[...] + beta_ref[...]
    hb = h.astype(jnp.bfloat16)

    # q projection (scale C^-0.5 already folded into wq/bq in the wrapper)
    q = jnp.dot(hb, wq_ref[...], preferred_element_type=jnp.float32) + bq_ref[...]
    q_ref[0] = q.astype(jnp.bfloat16)

    # k projection written channel-major: kT[c_out, s] = sum_ci wk[c_out, ci] * h[s, ci]
    # (one layout change here, reused by every q tile in the attention pass)
    kt = lax.dot_general(wk_ref[...], hb, (((1,), (1,)), ((), ())),
                         preferred_element_type=jnp.float32) + bk_ref[...]
    kt_ref[0] = kt.astype(jnp.bfloat16)

    v = jnp.dot(hb, wv_ref[...], preferred_element_type=jnp.float32) + bv_ref[...]
    v_ref[0] = v.astype(jnp.bfloat16)


# ----------------------------------------------------------------------------
# kernel 3: flash attention over spatial positions + fused proj_out + residual
# ----------------------------------------------------------------------------
def flash_attn_kernel(x_ref, q_ref, kt_ref, v_ref, wp_ref, bp_ref, o_ref,
                      m_sc, l_sc, acc_sc):
    ki = pl.program_id(2)

    @pl.when(ki == 0)
    def _():
        m_sc[...] = jnp.full_like(m_sc, -jnp.inf)
        l_sc[...] = jnp.zeros_like(l_sc)
        acc_sc[...] = jnp.zeros_like(acc_sc)

    # (TQ, C) @ (C, TK) -> (TQ, TK); q is pre-scaled, k is pre-transposed
    s = jnp.dot(q_ref[0], kt_ref[0], preferred_element_type=jnp.float32)

    m_prev = m_sc[...]
    m_new = jnp.maximum(m_prev, jnp.max(s, axis=-1, keepdims=True))
    alpha = jnp.exp(m_prev - m_new)
    p = jnp.exp(s - m_new)
    l_sc[...] = alpha * l_sc[...] + jnp.sum(p, axis=-1, keepdims=True)
    acc_sc[...] = alpha * acc_sc[...] + jnp.dot(
        p.astype(jnp.bfloat16), v_ref[0], preferred_element_type=jnp.float32)
    m_sc[...] = m_new

    @pl.when(ki == pl.num_programs(2) - 1)
    def _():
        attn = acc_sc[...] * pl.reciprocal(l_sc[...], approx=True)
        out = jnp.dot(attn.astype(jnp.bfloat16), wp_ref[...],
                      preferred_element_type=jnp.float32) + bp_ref[...]
        o_ref[0] = (x_ref[0] + out).astype(o_ref.dtype)


# ----------------------------------------------------------------------------
# wrapper
# ----------------------------------------------------------------------------
def attn_block(x_nchw, params):
    B, C, H, W = x_nchw.shape
    assert C % NUM_GROUPS == 0, "GroupNorm(32) needs C divisible by 32"
    HW = H * W
    G = NUM_GROUPS
    f32, bf16 = jnp.float32, jnp.bfloat16

    vmem_cap = _vmem_cap_bytes()
    # smaller tiles on small-VMEM chips (v7x: 64 MiB), biggest-that-fits elsewhere
    seq_cap = 512 if vmem_cap >= (100 << 20) else 256
    TS = _pick_tile(HW, seq_cap)   # row tile for stats / projection passes
    TQ = _pick_tile(HW, seq_cap)   # query tile
    TK = _pick_tile(HW, seq_cap)   # key/value tile

    x_seq = jnp.transpose(x_nchw, (0, 2, 3, 1)).reshape(B, HW, C)

    # group membership matrices (one-hot): m_cg (C, G) and m_gc (G, C)
    gidx = jnp.arange(C) // (C // G)
    m_cg = (gidx[:, None] == jnp.arange(G)[None, :]).astype(f32)
    m_gc = m_cg.T

    gamma = params["gamma"].reshape(1, C).astype(f32)
    beta = params["beta"].reshape(1, C).astype(f32)
    scale = float(C) ** (-0.5)
    # 1x1 conv weights as bf16 MXU operands; attention scale folded into wq / bq
    wq_t = (params["wq"].T * scale).astype(bf16)   # (C_in, C_out)
    wk_o = params["wk"].astype(bf16)               # (C_out, C_in) -> used for k^T directly
    wv_t = params["wv"].T.astype(bf16)
    wp_t = params["wp"].T.astype(bf16)
    bq = (params["bq"] * scale).reshape(1, C).astype(f32)
    bk_col = params["bk"].reshape(C, 1).astype(f32)
    bv = params["bv"].reshape(1, C).astype(f32)
    bp = params["bp"].reshape(1, C).astype(f32)

    # ---- pass 1: GroupNorm sums (accumulated over HW tiles) -----------------
    stats_vmem = 2 * (TS * C * 4) + 4 * C * 4
    s1, s2 = pl.pallas_call(
        gn_stats_kernel,
        out_shape=(jax.ShapeDtypeStruct((B, 1, C), f32),
                   jax.ShapeDtypeStruct((B, 1, C), f32)),
        grid_spec=pltpu.PrefetchScalarGridSpec(
            num_scalar_prefetch=0,
            grid=(B, HW // TS),
            in_specs=[pl.BlockSpec((1, TS, C), lambda b, t: (b, t, 0))],
            out_specs=[pl.BlockSpec((1, 1, C), lambda b, t: (b, 0, 0)),
                       pl.BlockSpec((1, 1, C), lambda b, t: (b, 0, 0))]),
        compiler_params=pltpu.CompilerParams(
            dimension_semantics=("parallel", "arbitrary"),
            vmem_limit_bytes=_vmem_limit(vmem_cap, stats_vmem)),
    )(x_seq)

    # ---- pass 2: normalize + q/k/v projections ------------------------------
    # TODO(synk): weights/biases have constant block indices and are still double-buffered
    # by the default pipeliner; single-buffering them would save ~half their VMEM.
    qkv_vmem = (2 * (TS * C * 4 + 3 * TS * C * 2)          # x in + q/kT/v out, double-buffered
                + 2 * (3 * C * C * 2 + 2 * C * G * 4 + 8 * C * 4)
                + 2 * TS * C * 4)                           # f32 h / matmul temporaries
    q, kt, v = pl.pallas_call(
        functools.partial(norm_qkv_kernel, n_per_group=float(HW * (C // G))),
        out_shape=(jax.ShapeDtypeStruct((B, HW, C), bf16),
                   jax.ShapeDtypeStruct((B, C, HW), bf16),
                   jax.ShapeDtypeStruct((B, HW, C), bf16)),
        grid_spec=pltpu.PrefetchScalarGridSpec(
            num_scalar_prefetch=0,
            grid=(B, HW // TS),
            in_specs=[
                pl.BlockSpec((1, TS, C), lambda b, t: (b, t, 0)),   # x
                pl.BlockSpec((1, 1, C), lambda b, t: (b, 0, 0)),    # s1
                pl.BlockSpec((1, 1, C), lambda b, t: (b, 0, 0)),    # s2
                pl.BlockSpec((C, G), lambda b, t: (0, 0)),          # m_cg
                pl.BlockSpec((G, C), lambda b, t: (0, 0)),          # m_gc
                pl.BlockSpec((1, C), lambda b, t: (0, 0)),          # gamma
                pl.BlockSpec((1, C), lambda b, t: (0, 0)),          # beta
                pl.BlockSpec((C, C), lambda b, t: (0, 0)),          # wq (scaled)
                pl.BlockSpec((1, C), lambda b, t: (0, 0)),          # bq (scaled)
                pl.BlockSpec((C, C), lambda b, t: (0, 0)),          # wk (out, in)
                pl.BlockSpec((C, 1), lambda b, t: (0, 0)),          # bk (column)
                pl.BlockSpec((C, C), lambda b, t: (0, 0)),          # wv
                pl.BlockSpec((1, C), lambda b, t: (0, 0)),          # bv
            ],
            out_specs=[
                pl.BlockSpec((1, TS, C), lambda b, t: (b, t, 0)),   # q (pre-scaled)
                pl.BlockSpec((1, C, TS), lambda b, t: (b, 0, t)),   # k^T
                pl.BlockSpec((1, TS, C), lambda b, t: (b, t, 0)),   # v
            ]),
        compiler_params=pltpu.CompilerParams(
            dimension_semantics=("parallel", "parallel"),
            vmem_limit_bytes=_vmem_limit(vmem_cap, qkv_vmem)),
    )(x_seq, s1, s2, m_cg, m_gc, gamma, beta, wq_t, bq, wk_o, bk_col, wv_t, bv)

    # ---- pass 3: flash attention + proj_out + residual ----------------------
    flash_vmem = (2 * (TQ * C * 4 + TQ * C * 2 + C * TK * 2 + TK * C * 2 + TQ * C * 4)
                  + 2 * (C * C * 2 + C * 4)
                  + TQ * C * 4 + 2 * TQ * 4
                  + 4 * TQ * TK * 4)                         # (TQ, TK) logits/p temporaries
    out_seq = pl.pallas_call(
        flash_attn_kernel,
        out_shape=jax.ShapeDtypeStruct((B, HW, C), x_seq.dtype),
        grid_spec=pltpu.PrefetchScalarGridSpec(
            num_scalar_prefetch=0,
            grid=(B, HW // TQ, HW // TK),
            in_specs=[
                pl.BlockSpec((1, TQ, C), lambda b, qi, ki: (b, qi, 0)),   # x (residual)
                pl.BlockSpec((1, TQ, C), lambda b, qi, ki: (b, qi, 0)),   # q
                pl.BlockSpec((1, C, TK), lambda b, qi, ki: (b, 0, ki)),   # k^T
                pl.BlockSpec((1, TK, C), lambda b, qi, ki: (b, ki, 0)),   # v
                pl.BlockSpec((C, C), lambda b, qi, ki: (0, 0)),           # wp
                pl.BlockSpec((1, C), lambda b, qi, ki: (0, 0)),           # bp
            ],
            out_specs=pl.BlockSpec((1, TQ, C), lambda b, qi, ki: (b, qi, 0)),
            scratch_shapes=[pltpu.VMEM((TQ, 1), jnp.float32),   # running max
                            pltpu.VMEM((TQ, 1), jnp.float32),   # running sum
                            pltpu.VMEM((TQ, C), jnp.float32)]), # running acc
        compiler_params=pltpu.CompilerParams(
            # q-tile axis parallel too -> v7x can shard (B, q-tiles) across both TCs
            dimension_semantics=("parallel", "parallel", "arbitrary"),
            vmem_limit_bytes=_vmem_limit(vmem_cap, flash_vmem)),
    )(x_seq, q, kt, v, wp_t, bp)

    return jnp.transpose(out_seq.reshape(B, H, W, C), (0, 3, 1, 2))


# ----------------------------------------------------------------------------
# pure-JAX reference matching the PyTorch forward
# ----------------------------------------------------------------------------
def attn_block_ref(x_nchw, params):
    B, C, H, W = x_nchw.shape
    G = NUM_GROUPS
    x = x_nchw
    xg = x.reshape(B, G, C // G, H, W)
    mean = jnp.mean(xg, axis=(2, 3, 4), keepdims=True)
    var = jnp.mean((xg - mean) ** 2, axis=(2, 3, 4), keepdims=True)
    h = ((xg - mean) / jnp.sqrt(var + EPS)).reshape(B, C, H, W)
    h = h * params["gamma"].reshape(1, C, 1, 1) + params["beta"].reshape(1, C, 1, 1)

    def conv1x1(t, w, b):
        return jnp.einsum("bchw,oc->bohw", t, w) + b.reshape(1, C, 1, 1)

    q = conv1x1(h, params["wq"], params["bq"]).reshape(B, C, H * W).transpose(0, 2, 1)
    k = conv1x1(h, params["wk"], params["bk"]).reshape(B, C, H * W)
    v = conv1x1(h, params["wv"], params["bv"]).reshape(B, C, H * W)
    w_ = jnp.einsum("bic,bcj->bij", q, k) * (float(C) ** -0.5)
    w_ = jax.nn.softmax(w_, axis=2)
    h_ = jnp.einsum("bcj,bij->bci", v, w_).reshape(B, C, H, W)
    h_ = conv1x1(h_, params["wp"], params["bp"])
    return x + h_


if __name__ == "__main__":
    # GroupNorm(num_groups=32) requires channels divisible by 32.
    B, C, H, W = 2, 64, 8, 8

    key = jax.random.PRNGKey(0)
    keys = jax.random.split(key, 12)
    params = {
        "gamma": 1.0 + 0.1 * jax.random.normal(keys[0], (C,), jnp.float32),
        "beta": 0.1 * jax.random.normal(keys[1], (C,), jnp.float32),
        "wq": 0.05 * jax.random.normal(keys[2], (C, C), jnp.float32),
        "bq": 0.05 * jax.random.normal(keys[3], (C,), jnp.float32),
        "wk": 0.05 * jax.random.normal(keys[4], (C, C), jnp.float32),
        "bk": 0.05 * jax.random.normal(keys[5], (C,), jnp.float32),
        "wv": 0.05 * jax.random.normal(keys[6], (C, C), jnp.float32),
        "bv": 0.05 * jax.random.normal(keys[7], (C,), jnp.float32),
        "wp": 0.05 * jax.random.normal(keys[8], (C, C), jnp.float32),
        "bp": 0.05 * jax.random.normal(keys[9], (C,), jnp.float32),
    }
    x = jax.random.normal(keys[10], (B, C, H, W), jnp.float32)

    out = attn_block(x, params)
    out = jax.block_until_ready(out)

    ref = attn_block_ref(x, params)
    assert out.shape == (B, C, H, W)
    # bf16 MXU operands (f32 accumulation) vs. the all-f32 reference -> slightly
    # looser tolerance than a pure-f32 kernel would need.
    err = float(jnp.max(jnp.abs(out - ref)))
    assert jnp.allclose(out, ref, atol=1e-2, rtol=1e-2), err

    print("KERNEL_OK")
</pallas_src>

<mosaic_0001>
module attributes {stable_mosaic.version = 11 : i64} {
  func.func @gn_stats_kernel(%arg0: i32, %arg1: i32, %arg2: memref<1x64x64xf32, #tpu.memory_space<vmem>>, %arg3: memref<1x1x64xf32, #tpu.memory_space<vmem>>, %arg4: memref<1x1x64xf32, #tpu.memory_space<vmem>>) attributes {dimension_semantics = [#tpu.dimension_semantics<parallel>, #tpu.dimension_semantics<arbitrary>], iteration_bounds = array<i64: 2, 1>, scalar_prefetch = 0 : i64, scratch_operands = 0 : i64, tpu.core_type = #tpu.core_type<tc>, window_params = [{transform_indices = @transform_0, window_bounds = array<i64: 1, 64, 64>}, {transform_indices = @transform_1, window_bounds = array<i64: 1, 1, 64>}, {transform_indices = @transform_2, window_bounds = array<i64: 1, 1, 64>}]} {
    %c0_i32 = arith.constant 0 : i32
    %0 = arith.cmpi eq, %arg1, %c0_i32 : i32
    %1 = arith.extui %0 : i1 to i32
    %c0_i32_0 = arith.constant 0 : i32
    %2 = arith.cmpi ne, %1, %c0_i32_0 : i32
    scf.if %2 {
      %cst_16 = arith.constant 0.000000e+00 : f32
      %22 = vector.broadcast %cst_16 : f32 to vector<1x1x64xf32>
      %c0_17 = arith.constant 0 : index
      %c0_18 = arith.constant 0 : index
      %c0_19 = arith.constant 0 : index
      %23 = vector.load %arg3[%c0_17, %c0_18, %c0_19] : memref<1x1x64xf32, #tpu.memory_space<vmem>>, vector<1x1x64xf32>
      tpu.vector_store %arg3[%c0_17, %c0_18, %c0_19], %22 {strides = array<i32>} : memref<1x1x64xf32, #tpu.memory_space<vmem>>, vector<1x1x64xf32>,
      %cst_20 = arith.constant 0.000000e+00 : f32
      %24 = vector.broadcast %cst_20 : f32 to vector<1x1x64xf32>
      %c0_21 = arith.constant 0 : index
      %c0_22 = arith.constant 0 : index
      %c0_23 = arith.constant 0 : index
      %25 = vector.load %arg4[%c0_21, %c0_22, %c0_23] : memref<1x1x64xf32, #tpu.memory_space<vmem>>, vector<1x1x64xf32>
      tpu.vector_store %arg4[%c0_21, %c0_22, %c0_23], %24 {strides = array<i32>} : memref<1x1x64xf32, #tpu.memory_space<vmem>>, vector<1x1x64xf32>,
    } else {
    }
    %c0 = arith.constant 0 : index
    %c0_1 = arith.constant 0 : index
    %c0_2 = arith.constant 0 : index
    %3 = vector.load %arg2[%c0, %c0_1, %c0_2] : memref<1x64x64xf32, #tpu.memory_space<vmem>>, vector<1x64x64xf32>
    %4 = vector.shape_cast %3 : vector<1x64x64xf32> to vector<64x64xf32>
    %c0_3 = arith.constant 0 : index
    %c0_4 = arith.constant 0 : index
    %c0_5 = arith.constant 0 : index
    %5 = vector.load %arg3[%c0_3, %c0_4, %c0_5] : memref<1x1x64xf32, #tpu.memory_space<vmem>>, vector<1x1x64xf32>
    %6 = vector.shape_cast %5 : vector<1x1x64xf32> to vector<1x64xf32>
    %cst = arith.constant dense<0.000000e+00> : vector<64xf32>
    %7 = vector.multi_reduction <add>, %4, %cst [0] : vector<64x64xf32> to vector<64xf32>
    %8 = vector.shape_cast %7 : vector<64xf32> to vector<1x64xf32>
    %9 = arith.addf %6, %8 : vector<1x64xf32>
    %c0_6 = arith.constant 0 : index
    %c0_7 = arith.constant 0 : index
    %c0_8 = arith.constant 0 : index
    %10 = vector.load %arg3[%c0_6, %c0_7, %c0_8] : memref<1x1x64xf32, #tpu.memory_space<vmem>>, vector<1x1x64xf32>
    %11 = vector.shape_cast %10 : vector<1x1x64xf32> to vector<1x64xf32>
    %12 = vector.shape_cast %9 : vector<1x64xf32> to vector<1x1x64xf32>
    tpu.vector_store %arg3[%c0_6, %c0_7, %c0_8], %12 {strides = array<i32>} : memref<1x1x64xf32, #tpu.memory_space<vmem>>, vector<1x1x64xf32>,
    %c0_9 = arith.constant 0 : index
    %c0_10 = arith.constant 0 : index
    %c0_11 = arith.constant 0 : index
    %13 = vector.load %arg4[%c0_9, %c0_10, %c0_11] : memref<1x1x64xf32, #tpu.memory_space<vmem>>, vector<1x1x64xf32>
    %14 = vector.shape_cast %13 : vector<1x1x64xf32> to vector<1x64xf32>
    %15 = arith.mulf %4, %4 : vector<64x64xf32>
    %cst_12 = arith.constant dense<0.000000e+00> : vector<64xf32>
    %16 = vector.multi_reduction <add>, %15, %cst_12 [0] : vector<64x64xf32> to vector<64xf32>
    %17 = vector.shape_cast %16 : vector<64xf32> to vector<1x64xf32>
    %18 = arith.addf %14, %17 : vector<1x64xf32>
    %c0_13 = arith.constant 0 : index
    %c0_14 = arith.constant 0 : index
    %c0_15 = arith.constant 0 : index
    %19 = vector.load %arg4[%c0_13, %c0_14, %c0_15] : memref<1x1x64xf32, #tpu.memory_space<vmem>>, vector<1x1x64xf32>
    %20 = vector.shape_cast %19 : vector<1x1x64xf32> to vector<1x64xf32>
    %21 = vector.shape_cast %18 : vector<1x64xf32> to vector<1x1x64xf32>
    tpu.vector_store %arg4[%c0_13, %c0_14, %c0_15], %21 {strides = array<i32>} : memref<1x1x64xf32, #tpu.memory_space<vmem>>, vector<1x1x64xf32>,
    return
  }
  func.func @transform_0(%arg0: i32, %arg1: i32) -> (i32, i32, i32) {
    %c0_i32 = arith.constant 0 : i32
    %c0_i32_0 = arith.constant 0 : i32
    return %arg0, %arg1, %c0_i32 : i32, i32, i32
  }
  func.func @transform_1(%arg0: i32, %arg1: i32) -> (i32, i32, i32) {
    %c0_i32 = arith.constant 0 : i32
    %c0_i32_0 = arith.constant 0 : i32
    %c0_i32_1 = arith.constant 0 : i32
    return %arg0, %c0_i32, %c0_i32_0 : i32, i32, i32
  }
  func.func @transform_2(%arg0: i32, %arg1: i32) -> (i32, i32, i32) {
    %c0_i32 = arith.constant 0 : i32
    %c0_i32_0 = arith.constant 0 : i32
    %c0_i32_1 = arith.constant 0 : i32
    return %arg0, %c0_i32, %c0_i32_0 : i32, i32, i32
  }
}

</mosaic_0001>

<bundles_post_ra>
// kernel: tpu_custom_call.1
= control target key start
LH: loop header
LB: loop body
LE: loop exit
PB: predicated region body
PF: predicated region fallthrough
CT: control target
= control target key end

     0   :  { %8 = vsyncpa [#allocation3], 0  ;;  %s899_s0 = inlined_call_operand.hbm [shape: f32[2,64,64], index: 0, kind: input, shape index: {}]   ;;  %s900_s1 = inlined_call_operand.hbm [shape: f32[2,1,64], index: 1, kind: output, shape index: {0}]   ;;  %s901_s2 = inlined_call_operand.hbm [shape: f32[2,1,64], index: 2, kind: output, shape index: {1}]  }
   0x1   :  { %10 = vsyncpa [#allocation3 + $0x1], 0 }
   0x2   :  { %11 = vsyncpa [#allocation4], 0 }
   0x3   :  { %13 = vsyncpa [#allocation4 + $0x1], 0 }
   0x4   :  { %14 = vsyncpa [#allocation7], 0 }
   0x5   :  { %16 = vsyncpa [#allocation7 + $0x1], 0  ;;  %s647_s9 = smov 0   ;;  %s649_s10 = smov 0  }
   0x6   :  { %s651_s11 = smov 0   ;;  %s653_s12 = smov 0  }
   0x7   :  { %s655_s13 = smov 0   ;;  %s657_s14 = smov 0  }
   0x8 LB: > { %s396_s15 = sadd.s32 4294967295, %s624_s14   ;;  %s397_s16 = sadd.s32 4294967294, %s624_s14   ;;  %s624_s14 = sphi %s657_s14, %s22_s14   ;;  %s620_s13 = sphi %s655_s13, %s916_s13   ;;  %s616_s12 = sphi %s653_s12, %s915_s12   ;;  %s612_s11 = sphi %s651_s11, %s914_s11   ;;  %s608_s10 = sphi %s649_s10, %s913_s10   ;;  %s604_s9 = sphi %s647_s9, %s912_s9  }
   0x9   : > { %s34_s17 = sadd.s32 1, %s620_s13  ;;  %s43_s18 = sadd.s32 1, %s612_s11 }
   0xa   : > { %p36_p0 = scmp.ge.s32.totalorder %s34_s17, 2  ;;  %p50_p1 = scmp.ne.s32.totalorder %s612_s11, %s608_s10 }
   0xb   : > { %p51_p2 = scmp.eq.s32.totalorder %s624_s14, 0  ;;  %p56_p3 = scmp.ne.s32.totalorder %s608_s10, %s604_s9 }
   0xc   : > { %s918_s17 = smov (%p36_p0, %s34_s17), 0  ;;  %p57_p5 = scmp.eq.s32.totalorder %s396_s15, 0 }
   0xd   : > { %p688_p4 = por %p51_p2, %p50_p1  ;;  %s38_s20 = ssub.s32 %s620_s13, %s918_s17 }
   0xe   : > { %p80_p6 = scmp.eq.s32.totalorder %s396_s15, 1  ;;  %p41_p7 = scmp.eq.s32.totalorder %s38_s20, 0 }
   0xf   : > { %p694_p8 = por %p57_p5, %p56_p3  ;;  %p86_p10 = scmp.eq.s32.totalorder %s397_s16, 1 }
  0x10   : > { %p698_p9 = por %p80_p6, %p50_p1  ;;  %p427_p13 = scmp.lt.s32.totalorder %s624_s14, 2 }
  0x11   : > { %s703_s23 = scalar_select %p41_p7, %s612_s11, %s43_s18  }
  0x12   : > { %s905_s22 = scalar_select %p698_p9, 1, 0 }
  0x13   : > { %p705_p11 = por %p86_p10, %p56_p3  ;;  %s132_s25 = sand.u32 1, %s612_s11  }
  0x14   : > { %s400_s26 = sshll.u32 %s132_s25, 6  ;;  %s409_s27 = sshll.u32 %s620_s13, 10 }
  0x15   : > { %s906_s24 = scalar_select %p705_p11, 1, 0 }
  0x16   : > { %s716_s30 = scalar_lea.hbm %s899_s0, %s409_s27  ;;  %s136_s3 = scalar_lea.vmem [#allocation2], %s400_s26 }
  0x17   : > { %s145_s4 = sshll.u32 %s136_s3, 4  ;;  %p722_p0 = pnand %p427_p13, %p688_p4  ;;  %s718_s4 = int_to_ptr.vmem [resolvable:$true] %s145_s4 }
  0x18   : > { %s727_s6 = scalar_lea.sflag [#allocation3], %s132_s25  ;;  %s480_s7 = scalar_lea.hbm %s716_s30, 1024 }
  0x19   : > { %p481_p2 = scmp.ne.s32.totalorder %s716_s30, %s480_s7  ;;  %p482_p3 = pneg %p722_p0 }
  0x1a   : > { %s485_s16 = scalar_lea.hbm %s899_s0, 2048  ;;  %p486_p4 = scmp.lt.u32.totalorder %s716_s30, %s899_s0 }
  0x1b   : > { %p483_p5 = pnand %p482_p3, %p481_p2  ;;  %p487_p7 = scmp.lt.u32.totalorder %s485_s16, %s480_s7 }
  0x1c   : > { %p489_p13 = scmp.lt.u32.totalorder %s480_s7, %s716_s30 }
  0x1d   : > { %p484_p6 = pneg %p483_p5  ;;  %p488_p10 = por %p487_p7, %p486_p4 }
  0x1f   : > { %p490_p12 = por %p489_p13, %p488_p10 }
  0x21   : > { %p491_p1 = pnand %p490_p12, %p484_p6 }
  0x23   : > { %494 = shalt.err (!%p491_p1)
}
  0x24   : > { %s495_s20 = scalar_lea.vmem %s718_s4, 1024  ;;  %s626_s25 = smov [#allocation2]  }
  0x25   : > { %p496_p2 = scmp.ne.s32.totalorder %s718_s4, %s495_s20  ;;  %s500_s26 = sshll.u32 %s626_s25, 4  ;;  %s501_s26 = int_to_ptr.vmem [resolvable:$false] %s500_s26 }
  0x26   : > { %s502_s27 = scalar_lea.vmem %s501_s26, 2048  ;;  %p503_p9 = scmp.lt.s32.totalorder %s718_s4, %s501_s26 }
  0x27   : > { %p498_p5 = pnand %p496_p2, %p482_p3  ;;  %p504_p4 = scmp.lt.s32.totalorder %s502_s27, %s495_s20 }
  0x29   : > { %p499_p11 = pneg %p498_p5  ;;  %p505_p7 = por %p504_p4, %p503_p9 }
  0x2b   : > { %p506_p10 = pnand %p505_p7, %p499_p11 }
  0x2d   : > { %509 = shalt.err (!%p506_p10)
}
  0x2e   : > { %s627_s28 = smov 128   ;;  %s628_s29 = smov 8  }
  0x2f   : > { %419 = dma.hbm_to_vmem [thread:$0]  (!%p722_p0), %s716_s30, 1024, %s718_s4, %s727_s6, %s627_s28, %s627_s28, %s628_s29  }
  0x30   : > { %p153_p12 = scmp.lt.s32.totalorder %s624_s14, 3  ;;  %p908_p1 = scmp.ge.s32.totalorder %s624_s14, 1 }
  0x32   : > { %p154_p3 = pnand %p908_p1, %p153_p12 }
  0x33   : > { %s759_s3 = sand.u32 (!%p154_p3), 1, %s608_s10  }
  0x34   : > { %157 = sbr.rel (%p154_p3) target bundleno = 128 (0x80), region = 24  ;;  %s404_s7 = sshll.u32 (!%p154_p3), %s759_s3, 6 }
  0x35   : > { %s160_s8 = scalar_lea.sflag (!%p154_p3), [#allocation3], %s759_s3  ;;  %s763_s15 = scalar_lea.vmem (!%p154_p3), [#allocation2], %s404_s7 }
  0x3b   : > { %591 = dma.done.wait (%p694_p8), %s160_s8, 1024  }
  0x3c   : > { %593 = vsyncadd (%p694_p8), %s160_s8, 4294966272  ;;  %vm192_vm0 = vcmask 516096   ;;  %s770_s30 = scalar_lea.vmem [#allocation5], %s759_s3  ;;  %v629_v0 = vmov 0.0   ;;  %s775_s4 = scalar_lea.vmem [#allocation6], %s759_s3  ;;  %vm204_vm1 = vcmask 523264  }
  0x3d   : > { %193 = vst.msk [vmem:[%s770_s30] sm:$0x1] %vm192_vm0, %v629_v0  ;;  %194 = vst.msk [vmem:[%s775_s4] sm:$0x1] %vm192_vm0, %v629_v0  ;;  %v195_v1 = vld [vmem:[%s763_s15] sm:$0xff]  ;;  %v196_v2 = vld [vmem:[%s763_s15 + $0x8] sm:$0xff] }
  0x3e   : > { %v197_v3 = vld [vmem:[%s763_s15 + $0x10] sm:$0xff]  ;;  %v198_v4 = vld [vmem:[%s763_s15 + $0x18] sm:$0xff]  ;;  %v205_v5 = vsel %vm204_vm1, %v195_v1, 0.0  ;;  %v206_v6 = vsel %vm204_vm1, %v196_v2, 0.0  ;;  %v230_v8 = vmul.f32 %v195_v1, %v195_v1  ;;  %v199_v9 = vld [vmem:[%s763_s15 + $0x20] sm:$0xff]  ;;  %v231_v11 = vmul.f32 %v196_v2, %v196_v2  ;;  %s405_s21 = sshll.u32 %s616_s12, 4 }
  0x3f   : > { %v208_v7 = vsel %vm204_vm1, %v197_v3, 0.0  ;;  %v207_v10 = vadd.f32 %v206_v6, %v205_v5  ;;  %v210_v12 = vsel %vm204_vm1, %v198_v4, 0.0  ;;  %v232_v13 = vmul.f32 %v197_v3, %v197_v3  ;;  %v200_v14 = vld [vmem:[%s763_s15 + $0x28] sm:$0xff]  ;;  %v201_v21 = vld [vmem:[%s763_s15 + $0x30] sm:$0xff]  ;;  %v202_v28 = vld [vmem:[%s763_s15 + $0x38] sm:$0xff]  ;;  %s278_s5 = sshll.u32 %s770_s30, 4  ;;  %s811_s18 = scalar_lea.hbm %s900_s1, %s405_s21  ;;  %s813_s5 = int_to_ptr.vmem [resolvable:$true] %s278_s5 }
  0x40   : > { %v233_v16 = vmul.f32 %v198_v4, %v198_v4  ;;  %v212_v17 = vsel %vm204_vm1, %v199_v9, 0.0  ;;  %v234_v18 = vmul.f32 %v199_v9, %v199_v9  ;;  %v238_v19 = vsel %vm204_vm1, %v230_v8, 0.0  ;;  %s291_s19 = sshll.u32 %s775_s4, 4  ;;  %s262_s20 = scalar_lea.sflag [#allocation4], %s759_s3  ;;  %s850_s19 = int_to_ptr.vmem [resolvable:$true] %s291_s19 }
  0x41   : > { %v209_v15 = vadd.f32 %v208_v7, %v207_v10  ;;  %v239_v20 = vsel %vm204_vm1, %v231_v11, 0.0  ;;  %v241_v24 = vsel %vm204_vm1, %v232_v13, 0.0  ;;  %v214_v25 = vsel %vm204_vm1, %v200_v14, 0.0  ;;  %s510_s25 = scalar_lea.vmem %s813_s5, 16  ;;  %p909_p9 = scmp.ne.s32.totalorder %s905_s22, 0 }
  0x42   : > { %v240_v23 = vadd.f32 %v239_v20, %v238_v19  ;;  %v235_v26 = vmul.f32 %v200_v14, %v200_v14  ;;  %v243_v27 = vsel %vm204_vm1, %v233_v16, 0.0  ;;  %v216_v31 = vsel %vm204_vm1, %v201_v21, 0.0  ;;  %p511_p8 = scmp.ne.s32.totalorder %s813_s5, %s510_s25  ;;  %s630_s26 = smov [#allocation5]  }
  0x43   : > { %v211_v22 = vadd.f32 %v210_v12, %v209_v15  ;;  %v236_v32 = vmul.f32 %v201_v21, %v201_v21  ;;  %v245_v33 = vsel %vm204_vm1, %v234_v18, 0.0  ;;  %v218_v36 = vsel %vm204_vm1, %v202_v28, 0.0  ;;  %s514_s27 = sshll.u32 %s630_s26, 4  ;;  %s515_s27 = int_to_ptr.vmem [resolvable:$false] %s514_s27 }
  0x44   : > { %v242_v30 = vadd.f32 %v241_v24, %v240_v23  ;;  %v237_v37 = vmul.f32 %v202_v28, %v202_v28  ;;  %v247_v38 = vsel %vm204_vm1, %v235_v26, 0.0  ;;  %v203_v55 = vld [vmem:[%s770_s30] sm:$0x1]  ;;  %p512_p11 = pnand %p511_p8, %p909_p9  ;;  %s516_s28 = scalar_lea.vmem %s515_s27, 32 }
  0x45   : > { %v213_v29 = vadd.f32 %v212_v17, %v211_v22  ;;  %v249_v41 = vsel %vm204_vm1, %v236_v32, 0.0  ;;  %v229_v60 = vld [vmem:[%s775_s4] sm:$0x1]  ;;  %p517_p6 = scmp.lt.s32.totalorder %s813_s5, %s515_s27  ;;  %p518_p13 = scmp.lt.s32.totalorder %s516_s28, %s510_s25 }
  0x46   : > { %v244_v35 = vadd.f32 %v243_v27, %v242_v30  ;;  %v251_v44 = vsel %vm204_vm1, %v237_v37, 0.0  ;;  %p513_p0 = pneg %p512_p11 }
  0x47   : > { %v215_v34 = vadd.f32 %v214_v25, %v213_v29  ;;  %p519_p2 = por %p518_p13, %p517_p6 }
  0x48   : > { %v246_v40 = vadd.f32 %v245_v33, %v244_v35 }
  0x49   : > { %v217_v39 = vadd.f32 %v216_v31, %v215_v34  ;;  %p520_p5 = pnand %p519_p2, %p513_p0 }
  0x4a   : > { %v248_v43 = vadd.f32 %v247_v38, %v246_v40 }
  0x4b   : > { %v219_v42 = vadd.f32 %v218_v36, %v217_v39 }
  0x4c   : > { %v250_v46 = vadd.f32 %v249_v41, %v248_v43 }
  0x4d   : > { %v220_v45 = vrot.slane %v219_v42, 4 }
  0x4e   : > { %v252_v48 = vadd.f32 %v251_v44, %v250_v46 }
  0x4f   : > { %v221_v47 = vadd.f32 %v220_v45, %v219_v42 }
  0x50   : > { %v253_v50 = vrot.slane %v252_v48, 4 }
  0x51   : > { %v222_v49 = vrot.slane %v221_v47, 2 }
  0x52   : > { %v254_v52 = vadd.f32 %v253_v50, %v252_v48 }
  0x53   : > { %v223_v51 = vadd.f32 %v222_v49, %v221_v47 }
  0x54   : > { %v255_v54 = vrot.slane %v254_v52, 2 }
  0x55   : > { %v224_v53 = vrot.slane %v223_v51, 1 }
  0x56   : > { %v256_v57 = vadd.f32 %v255_v54, %v254_v52 }
  0x57   : > { %v225_v56 = vadd.f32 %v224_v53, %v223_v51 }
  0x58   : > { %v257_v59 = vrot.slane %v256_v57, 1 }
  0x59   : > { %v226_v58 = vadd.f32 %v225_v56, %v203_v55 }
  0x5a   : > { %v258_v61 = vadd.f32 %v257_v59, %v256_v57 }
  0x5b   : > { %228 = vst.msk [vmem:[%s770_s30] sm:$0x1] %vm192_vm0, %v226_v58 }
  0x5c   : > { %523 = shalt.err (!%p520_p5)
}
  0x5d   : > { %s524_s29 = scalar_lea.hbm %s811_s18, 16  ;;  %s528_s15 = scalar_lea.hbm %s900_s1, 32 }
  0x5e   : > { %p525_p4 = scmp.ne.s32.totalorder %s811_s18, %s524_s29  ;;  %p529_p12 = scmp.lt.u32.totalorder %s811_s18, %s900_s1 }
  0x5f   : > { %p530_p1 = scmp.lt.u32.totalorder %s528_s15, %s524_s29  ;;  %p532_p8 = scmp.lt.u32.totalorder %s524_s29, %s811_s18 }
  0x60   : > { %p526_p7 = pnand %p525_p4, %p909_p9 }
  0x61   : > { %p531_p3 = por %p530_p1, %p529_p12 }
  0x62   : > { %p527_p10 = pneg %p526_p7 }
  0x63   : > { %p533_p11 = por %p532_p8, %p531_p3 }
  0x65   : > { %p534_p0 = pnand %p533_p11, %p527_p10 }
  0x67   : > { %537 = shalt.err (!%p534_p0)
}
  0x68   : > { %412 = dma.vmem_to_hbm [thread:$0]  (%p909_p9), %s813_s5, 16, %s811_s18, %s262_s20   ;;  %v259_v62 = vadd.f32 %v258_v61, %v229_v60 }
  0x69   : > { %s846_s26 = scalar_lea.hbm %s901_s2, %s405_s21  ;;  %s266_s27 = scalar_lea.sflag [#allocation7], %s759_s3 }
  0x6a   : > { %260 = vst.msk [vmem:[%s775_s4] sm:$0x1] %vm192_vm0, %v259_v62  ;;  %s538_s28 = scalar_lea.vmem %s850_s19, 16  ;;  %s631_s12 = smov [#allocation6]  }
  0x6b   : > { %p539_p6 = scmp.ne.s32.totalorder %s850_s19, %s538_s28  ;;  %s542_s5 = sshll.u32 %s631_s12, 4  ;;  %s543_s5 = int_to_ptr.vmem [resolvable:$false] %s542_s5 }
  0x6c   : > { %s544_s18 = scalar_lea.vmem %s543_s5, 32  ;;  %p545_p5 = scmp.lt.s32.totalorder %s850_s19, %s543_s5 }
  0x6d   : > { %p540_p13 = pnand %p539_p6, %p909_p9  ;;  %p546_p4 = scmp.lt.s32.totalorder %s544_s18, %s538_s28 }
  0x6f   : > { %p541_p2 = pneg %p540_p13  ;;  %p547_p7 = por %p546_p4, %p545_p5 }
  0x71   : > { %p548_p10 = pnand %p547_p7, %p541_p2 }
  0x73   : > { %551 = shalt.err (!%p548_p10)
}
  0x74   : > { %s552_s3 = scalar_lea.hbm %s846_s26, 16  ;;  %s556_s20 = scalar_lea.hbm %s901_s2, 32 }
  0x75   : > { %p553_p12 = scmp.ne.s32.totalorder %s846_s26, %s552_s3  ;;  %p557_p8 = scmp.lt.u32.totalorder %s846_s26, %s901_s2 }
  0x76   : > { %p558_p11 = scmp.lt.u32.totalorder %s556_s20, %s552_s3  ;;  %p560_p6 = scmp.lt.u32.totalorder %s552_s3, %s846_s26 }
  0x77   : > { %p554_p1 = pnand %p553_p12, %p909_p9 }
  0x78   : > { %p559_p0 = por %p558_p11, %p557_p8 }
  0x79   : > { %p555_p3 = pneg %p554_p1 }
  0x7a   : > { %p561_p13 = por %p560_p6, %p559_p0 }
  0x7c   : > { %p562_p2 = pnand %p561_p13, %p555_p3 }
  0x7e   : > { %565 = shalt.err (!%p562_p2)
}
  0x7f   : > { %413 = dma.vmem_to_hbm [thread:$0]  (%p909_p9), %s850_s19, 16, %s846_s26, %s266_s27  }
  0x80 PF: > { %s303_s8 = sand.u32 1, %s604_s9   ;;  %p910_p5 = scmp.ne.s32.totalorder %s906_s24, 0 }
  0x81   : > { %p911_p4 = scmp.ge.s32.totalorder %s624_s14, 2  ;;  %s304_s15 = scalar_lea.sflag [#allocation4], %s303_s8 }
  0x83   : > { %p421_p7 = pnand %p911_p4, %p910_p5 }
  0x85   : > { %595 = dma.done.wait (!%p421_p7), %s304_s15, 16  }
  0x86   : > { %597 = vsyncadd (!%p421_p7), %s304_s15, 4294967280  ;;  %s312_s30 = scalar_lea.sflag [#allocation7], %s303_s8 }
  0x87   : > { %599 = dma.done.wait (!%p421_p7), %s312_s30, 16  }
  0x88   : > { %601 = vsyncadd (!%p421_p7), %s312_s30, 4294967280  ;;  %s22_s14 = sadd.s32 1, %s624_s14   ;;  %s912_s9 = smov %s608_s10 }
  0x89   : > { %p19_p10 = scmp.ge.s32.totalorder %s22_s14, 4   ;;  %s913_s10 = smov %s612_s11 }
  0x8a   : > { %s914_s11 = smov %s703_s23  ;;  %s915_s12 = smov %s620_s13 }
  0x8b   : > { %s916_s13 = smov %s918_s17  ;;  %21 = sbr.rel (!%p19_p10) target bundleno = 8 (0x8), region = 90 }
  0x92   :  { %316 = vsyncpa [#allocation3], 1 }
  0x93   :  { %318 = vsyncpa [#allocation3 + $0x1], 1 }
  0x94   :  { %319 = vsyncpa [#allocation4], 1 }
  0x95   :  { %321 = vsyncpa [#allocation4 + $0x1], 1 }
  0x96   :  { %322 = vsyncpa [#allocation7], 1 }
  0x97   :  { %324 = vsyncpa [#allocation7 + $0x1], 1 }

</bundles_post_ra>
